<compile_context>
chip_gen: v7x
topology: tpu7x:2x2x1
jax: 0.10.0
libtpu: 0.0.40
codegen_flags: <defaults>
</compile_context>

<pallas_src>
import math

import jax
import jax.numpy as jnp
from jax.experimental import pallas as pl
from jax.experimental.pallas import tpu as pltpu

NUM_CIRCUITS = 5
SPU_EMBED = NUM_CIRCUITS          # SPU_embedding_dim = num_circuits = 5
ATTN_DIM = 128                    # attention_dim
INPUT_DIM = 2                     # input_dim
UP_PROJ = 128                     # up_projection_dim
NUM_CLASSES = 2
D_RFF = 256                       # SNGP random-Fourier-feature width
LANE = 128
K_PAD = 8                         # q feature dim (5) padded to one sublane group

# Softmax is taken over the full lane axis; only valid because attention_dim
# is exactly one lane group. Guard against silent corruption if it changes.
assert ATTN_DIM == LANE


def _pad_to(a, shape):
    pads = [(0, s - d) for d, s in zip(a.shape, shape)]
    return jnp.pad(a, pads)


def sngp_attention_kernel(x_ref, q_ref,
                          w_fused_ref, b_fused_ref,
                          w_cx_ref, w_ca_ref, b_c_ref,
                          w_rff_ref, b_rff_ref,
                          w_beta_ref, b_beta_ref,
                          out_ref):
    # x-path of the combine layer: x has only 2 real features, so do it as
    # broadcast-FMAs on the VPU (no MXU push/pop, independent of softmax).
    hx = (x_ref[:, 0:1] * w_cx_ref[0:1, :]
          + x_ref[:, 1:2] * w_cx_ref[1:2, :])

    # attention logits via the fused (W_spu @ W_att) weight: one small matmul
    # replaces the spu-projection + attention matmul pair.
    att_logits = jnp.dot(q_ref[...], w_fused_ref[...],
                         preferred_element_type=jnp.float32) + b_fused_ref[...]

    # softmax over the attention dim (== 128 lanes, no padding in this axis).
    m = jnp.max(att_logits, axis=-1, keepdims=True)
    e = jnp.exp(att_logits - m)
    denom = jnp.sum(e, axis=-1, keepdims=True)
    att = e * pl.reciprocal(denom, approx=True)

    # combined = cat([x, att], dim=1) @ W_comb + b_comb
    #          = hx + att @ W_comb[input_dim:] + b_comb
    h = hx + jnp.dot(att, w_ca_ref[...],
                     preferred_element_type=jnp.float32) + b_c_ref[...]

    # SNGP head modeled as a random-Fourier-feature GP readout:
    #   phi = sqrt(2/D) * cos(h @ W_rff + b_rff);  logits = phi @ beta + b
    # TODO(synk): SNGP class is not defined in the source snippet; this is the
    # standard RFF-GP logits path (covariance output of the tuple is dropped,
    # matching `logits = logits[0]`).
    phi = math.sqrt(2.0 / D_RFF) * jnp.cos(
        jnp.dot(h, w_rff_ref[...], preferred_element_type=jnp.float32)
        + b_rff_ref[...])
    out_ref[...] = jnp.dot(phi, w_beta_ref[...],
                           preferred_element_type=jnp.float32) + b_beta_ref[...]


def sngp_attention_forward(x, q, params):
    """x: [B, INPUT_DIM] f32, q: [B, NUM_CIRCUITS] f32 -> logits [B, NUM_CLASSES]."""
    B = x.shape[0]

    # Pad batch to a multiple of 8 (sublane-dense stores); tile large batches.
    b8 = ((B + 7) // 8) * 8
    TB = b8 if b8 <= 512 else 512
    B_pad = ((b8 + TB - 1) // TB) * TB

    x_p = _pad_to(x.astype(jnp.float32), (B_pad, INPUT_DIM))
    q_p = _pad_to(q.astype(jnp.float32), (B_pad, K_PAD))

    # Algebraic fusion of spu_projection into attention (done once, in XLA):
    #   att_logits = q @ (W_spu @ W_att) + (b_spu @ W_att + b_att)
    w_fused = params["w_spu"] @ params["w_att"]                    # [5, 128]
    b_fused = params["b_spu"] @ params["w_att"] + params["b_att"]  # [1, 128]
    w_fused_p = _pad_to(w_fused, (K_PAD, ATTN_DIM))                # pad rows 5->8 (zeros)

    w_cx = params["w_comb"][:INPUT_DIM]                            # [2, 128]  (VPU path)
    w_ca = params["w_comb"][INPUT_DIM:]                            # [128, 128]
    b_c = params["b_comb"]                                         # [1, 128]
    w_rff = params["w_rff"]                                        # [128, 256]
    b_rff = params["b_rff"]                                        # [1, 256]
    w_beta_p = _pad_to(params["w_beta"], (D_RFF, LANE))            # [256, 128] (zero pad)
    b_beta_p = _pad_to(params["b_beta"], (1, LANE))                # [1, 128]

    grid = (B_pad // TB,)

    def row_spec(shape):       # batch-tiled operands
        return pl.BlockSpec(shape, lambda i: (i, 0))

    def rep_spec(shape):       # weights: same block every grid step (stay resident)
        return pl.BlockSpec(shape, lambda i: (0, 0))

    out_p = pl.pallas_call(
        sngp_attention_kernel,
        out_shape=jax.ShapeDtypeStruct((B_pad, LANE), jnp.float32),
        grid=grid,
        in_specs=[
            row_spec((TB, INPUT_DIM)),        # x
            row_spec((TB, K_PAD)),            # q
            rep_spec((K_PAD, ATTN_DIM)),      # w_fused
            rep_spec((1, ATTN_DIM)),          # b_fused
            rep_spec((INPUT_DIM, UP_PROJ)),   # w_cx
            rep_spec((ATTN_DIM, UP_PROJ)),    # w_ca
            rep_spec((1, UP_PROJ)),           # b_comb
            rep_spec((UP_PROJ, D_RFF)),       # w_rff
            rep_spec((1, D_RFF)),             # b_rff
            rep_spec((D_RFF, LANE)),          # w_beta (lane-padded)
            rep_spec((1, LANE)),              # b_beta (lane-padded)
        ],
        out_specs=row_spec((TB, LANE)),
        compiler_params=pltpu.CompilerParams(
            dimension_semantics=("parallel",)),
    )(x_p, q_p, w_fused_p, b_fused, w_cx, w_ca, b_c,
      w_rff, b_rff, w_beta_p, b_beta_p)

    return out_p[:B, :NUM_CLASSES]


def reference_forward(x, q, params):
    spu = q @ params["w_spu"] + params["b_spu"]
    att = jax.nn.softmax(spu @ params["w_att"] + params["b_att"], axis=1)
    comb = jnp.concatenate([x, att], axis=1)
    h = comb @ params["w_comb"] + params["b_comb"]
    phi = math.sqrt(2.0 / D_RFF) * jnp.cos(h @ params["w_rff"] + params["b_rff"])
    return phi @ params["w_beta"] + params["b_beta"]


def init_params(key):
    ks = jax.random.split(key, 10)

    def linear(kw, kb, fan_in, fan_out):
        bound = 1.0 / math.sqrt(fan_in)
        w = jax.random.uniform(kw, (fan_in, fan_out), jnp.float32, -bound, bound)
        b = jax.random.uniform(kb, (1, fan_out), jnp.float32, -bound, bound)
        return w, b

    w_spu, b_spu = linear(ks[0], ks[1], NUM_CIRCUITS, SPU_EMBED)
    w_att, b_att = linear(ks[2], ks[3], SPU_EMBED, ATTN_DIM)
    w_comb, b_comb = linear(ks[4], ks[5], INPUT_DIM + ATTN_DIM, UP_PROJ)
    # SNGP: fixed random projection + trainable output layer.
    w_rff = jax.random.normal(ks[6], (UP_PROJ, D_RFF), jnp.float32)
    b_rff = jax.random.uniform(ks[7], (1, D_RFF), jnp.float32, 0.0, 2.0 * math.pi)
    w_beta, b_beta = linear(ks[8], ks[9], D_RFF, NUM_CLASSES)
    return dict(w_spu=w_spu, b_spu=b_spu, w_att=w_att, b_att=b_att,
                w_comb=w_comb, b_comb=b_comb, w_rff=w_rff, b_rff=b_rff,
                w_beta=w_beta, b_beta=b_beta)


if __name__ == "__main__":
    B = 8
    key = jax.random.PRNGKey(0)
    k_param, k_x, k_q = jax.random.split(key, 3)
    params = init_params(k_param)
    x = jax.random.normal(k_x, (B, INPUT_DIM), jnp.float32)
    q = jax.random.normal(k_q, (B, NUM_CIRCUITS), jnp.float32)

    logits = sngp_attention_forward(x, q, params)
    jax.block_until_ready(logits)

    ref = reference_forward(x, q, params)
    assert logits.shape == (B, NUM_CLASSES)
    assert jnp.allclose(logits, ref, atol=1e-4, rtol=1e-4)
    print("KERNEL_OK")
</pallas_src>

<mosaic_0001>
module attributes {stable_mosaic.version = 11 : i64} {
  func.func @sngp_attention_kernel(%arg0: i32, %arg1: memref<8x2xf32, #tpu.memory_space<vmem>>, %arg2: memref<8x8xf32, #tpu.memory_space<vmem>>, %arg3: memref<8x128xf32, #tpu.memory_space<vmem>>, %arg4: memref<1x128xf32, #tpu.memory_space<vmem>>, %arg5: memref<2x128xf32, #tpu.memory_space<vmem>>, %arg6: memref<128x128xf32, #tpu.memory_space<vmem>>, %arg7: memref<1x128xf32, #tpu.memory_space<vmem>>, %arg8: memref<128x256xf32, #tpu.memory_space<vmem>>, %arg9: memref<1x256xf32, #tpu.memory_space<vmem>>, %arg10: memref<256x128xf32, #tpu.memory_space<vmem>>, %arg11: memref<1x128xf32, #tpu.memory_space<vmem>>, %arg12: memref<8x128xf32, #tpu.memory_space<vmem>>) attributes {dimension_semantics = [#tpu.dimension_semantics<parallel>], iteration_bounds = array<i64: 1>, scalar_prefetch = 0 : i64, scratch_operands = 0 : i64, tpu.core_type = #tpu.core_type<tc>, window_params = [{transform_indices = @transform_0, window_bounds = array<i64: 8, 2>}, {transform_indices = @transform_1, window_bounds = array<i64: 8, 8>}, {pipeline_mode = #tpu.pipeline_mode<synchronous>, transform_indices = @transform_2, window_bounds = array<i64: 8, 128>}, {pipeline_mode = #tpu.pipeline_mode<synchronous>, transform_indices = @transform_3, window_bounds = array<i64: 1, 128>}, {pipeline_mode = #tpu.pipeline_mode<synchronous>, transform_indices = @transform_4, window_bounds = array<i64: 2, 128>}, {pipeline_mode = #tpu.pipeline_mode<synchronous>, transform_indices = @transform_5, window_bounds = array<i64: 128, 128>}, {pipeline_mode = #tpu.pipeline_mode<synchronous>, transform_indices = @transform_6, window_bounds = array<i64: 1, 128>}, {pipeline_mode = #tpu.pipeline_mode<synchronous>, transform_indices = @transform_7, window_bounds = array<i64: 128, 256>}, {pipeline_mode = #tpu.pipeline_mode<synchronous>, transform_indices = @transform_8, window_bounds = array<i64: 1, 256>}, {pipeline_mode = #tpu.pipeline_mode<synchronous>, transform_indices = @transform_9, window_bounds = array<i64: 256, 128>}, {pipeline_mode = #tpu.pipeline_mode<synchronous>, transform_indices = @transform_10, window_bounds = array<i64: 1, 128>}, {transform_indices = @transform_11, window_bounds = array<i64: 8, 128>}]} {
    %c0 = arith.constant 0 : index
    %c0_0 = arith.constant 0 : index
    %0 = vector.load %arg1[%c0, %c0_0] : memref<8x2xf32, #tpu.memory_space<vmem>>, vector<8x1xf32>
    %c0_1 = arith.constant 0 : index
    %c0_2 = arith.constant 0 : index
    %1 = vector.load %arg5[%c0_1, %c0_2] : memref<2x128xf32, #tpu.memory_space<vmem>>, vector<1x128xf32>
    %2 = vector.broadcast %0 : vector<8x1xf32> to vector<8x128xf32>
    %3 = vector.broadcast %1 : vector<1x128xf32> to vector<8x128xf32>
    %4 = arith.mulf %2, %3 : vector<8x128xf32>
    %c0_3 = arith.constant 0 : index
    %c1 = arith.constant 1 : index
    %5 = vector.load %arg1[%c0_3, %c1] : memref<8x2xf32, #tpu.memory_space<vmem>>, vector<8x1xf32>
    %c1_4 = arith.constant 1 : index
    %c0_5 = arith.constant 0 : index
    %6 = vector.load %arg5[%c1_4, %c0_5] : memref<2x128xf32, #tpu.memory_space<vmem>>, vector<1x128xf32>
    %7 = vector.broadcast %5 : vector<8x1xf32> to vector<8x128xf32>
    %8 = vector.broadcast %6 : vector<1x128xf32> to vector<8x128xf32>
    %9 = arith.mulf %7, %8 : vector<8x128xf32>
    %10 = arith.addf %4, %9 : vector<8x128xf32>
    %c0_6 = arith.constant 0 : index
    %c0_7 = arith.constant 0 : index
    %11 = vector.load %arg2[%c0_6, %c0_7] : memref<8x8xf32, #tpu.memory_space<vmem>>, vector<8x8xf32>
    %c0_8 = arith.constant 0 : index
    %c0_9 = arith.constant 0 : index
    %12 = vector.load %arg3[%c0_8, %c0_9] : memref<8x128xf32, #tpu.memory_space<vmem>>, vector<8x128xf32>
    %cst = arith.constant dense<0.000000e+00> : vector<8x128xf32>
    %13 = tpu.matmul %11, %12, %cst {dimension_numbers = #tpu.dot_dimension_numbers<[1], [0], [0], [1], [0, 0, 1, 1], [], []>} : vector<8x8xf32>, vector<8x128xf32>, vector<8x128xf32> -> vector<8x128xf32>
    %c0_10 = arith.constant 0 : index
    %c0_11 = arith.constant 0 : index
    %14 = vector.load %arg4[%c0_10, %c0_11] : memref<1x128xf32, #tpu.memory_space<vmem>>, vector<1x128xf32>
    %15 = vector.broadcast %14 : vector<1x128xf32> to vector<8x128xf32>
    %16 = arith.addf %13, %15 : vector<8x128xf32>
    %cst_12 = arith.constant dense<0xFF800000> : vector<8xf32>
    %17 = vector.multi_reduction <maximumf>, %16, %cst_12 [1] : vector<8x128xf32> to vector<8xf32>
    %18 = vector.shape_cast %17 : vector<8xf32> to vector<8x1xf32>
    %19 = vector.broadcast %18 : vector<8x1xf32> to vector<8x128xf32>
    %20 = arith.subf %16, %19 : vector<8x128xf32>
    %21 = math.exp %20 : vector<8x128xf32>
    %cst_13 = arith.constant dense<0.000000e+00> : vector<8xf32>
    %22 = vector.multi_reduction <add>, %21, %cst_13 [1] : vector<8x128xf32> to vector<8xf32>
    %23 = vector.shape_cast %22 : vector<8xf32> to vector<8x1xf32>
    %24 = tpu.reciprocal %23 {approx = true} : vector<8x1xf32> -> vector<8x1xf32>
    %25 = vector.broadcast %24 : vector<8x1xf32> to vector<8x128xf32>
    %26 = arith.mulf %21, %25 : vector<8x128xf32>
    %c0_14 = arith.constant 0 : index
    %c0_15 = arith.constant 0 : index
    %27 = vector.load %arg6[%c0_14, %c0_15] : memref<128x128xf32, #tpu.memory_space<vmem>>, vector<128x128xf32>
    %cst_16 = arith.constant dense<0.000000e+00> : vector<8x128xf32>
    %28 = tpu.matmul %26, %27, %cst_16 {dimension_numbers = #tpu.dot_dimension_numbers<[1], [0], [0], [1], [0, 0, 1, 1], [], []>} : vector<8x128xf32>, vector<128x128xf32>, vector<8x128xf32> -> vector<8x128xf32>
    %29 = arith.addf %10, %28 : vector<8x128xf32>
    %c0_17 = arith.constant 0 : index
    %c0_18 = arith.constant 0 : index
    %30 = vector.load %arg7[%c0_17, %c0_18] : memref<1x128xf32, #tpu.memory_space<vmem>>, vector<1x128xf32>
    %31 = vector.broadcast %30 : vector<1x128xf32> to vector<8x128xf32>
    %32 = arith.addf %29, %31 : vector<8x128xf32>
    %c0_19 = arith.constant 0 : index
    %c0_20 = arith.constant 0 : index
    %33 = vector.load %arg8[%c0_19, %c0_20] : memref<128x256xf32, #tpu.memory_space<vmem>>, vector<128x256xf32>
    %cst_21 = arith.constant dense<0.000000e+00> : vector<8x256xf32>
    %34 = tpu.matmul %32, %33, %cst_21 {dimension_numbers = #tpu.dot_dimension_numbers<[1], [0], [0], [1], [0, 0, 1, 1], [], []>} : vector<8x128xf32>, vector<128x256xf32>, vector<8x256xf32> -> vector<8x256xf32>
    %c0_22 = arith.constant 0 : index
    %c0_23 = arith.constant 0 : index
    %35 = vector.load %arg9[%c0_22, %c0_23] : memref<1x256xf32, #tpu.memory_space<vmem>>, vector<1x256xf32>
    %36 = vector.broadcast %35 : vector<1x256xf32> to vector<8x256xf32>
    %37 = arith.addf %34, %36 : vector<8x256xf32>
    %38 = math.cos %37 : vector<8x256xf32>
    %cst_24 = arith.constant 0.0883883461 : f32
    %39 = vector.broadcast %cst_24 : f32 to vector<8x256xf32>
    %40 = arith.mulf %39, %38 : vector<8x256xf32>
    %c0_25 = arith.constant 0 : index
    %c0_26 = arith.constant 0 : index
    %41 = vector.load %arg10[%c0_25, %c0_26] : memref<256x128xf32, #tpu.memory_space<vmem>>, vector<256x128xf32>
    %cst_27 = arith.constant dense<0.000000e+00> : vector<8x128xf32>
    %42 = tpu.matmul %40, %41, %cst_27 {dimension_numbers = #tpu.dot_dimension_numbers<[1], [0], [0], [1], [0, 0, 1, 1], [], []>} : vector<8x256xf32>, vector<256x128xf32>, vector<8x128xf32> -> vector<8x128xf32>
    %c0_28 = arith.constant 0 : index
    %c0_29 = arith.constant 0 : index
    %43 = vector.load %arg11[%c0_28, %c0_29] : memref<1x128xf32, #tpu.memory_space<vmem>>, vector<1x128xf32>
    %44 = vector.broadcast %43 : vector<1x128xf32> to vector<8x128xf32>
    %45 = arith.addf %42, %44 : vector<8x128xf32>
    %c0_30 = arith.constant 0 : index
    %c0_31 = arith.constant 0 : index
    %46 = vector.load %arg12[%c0_30, %c0_31] : memref<8x128xf32, #tpu.memory_space<vmem>>, vector<8x128xf32>
    tpu.vector_store %arg12[%c0_30, %c0_31], %45 {strides = array<i32>} : memref<8x128xf32, #tpu.memory_space<vmem>>, vector<8x128xf32>,
    return
  }
  func.func @transform_0(%arg0: i32) -> (i32, i32) {
    %c0_i32 = arith.constant 0 : i32
    %c0_i32_0 = arith.constant 0 : i32
    return %arg0, %c0_i32 : i32, i32
  }
  func.func @transform_1(%arg0: i32) -> (i32, i32) {
    %c0_i32 = arith.constant 0 : i32
    %c0_i32_0 = arith.constant 0 : i32
    return %arg0, %c0_i32 : i32, i32
  }
  func.func @transform_2(%arg0: i32) -> (i32, i32) {
    %c0_i32 = arith.constant 0 : i32
    %c0_i32_0 = arith.constant 0 : i32
    %c0_i32_1 = arith.constant 0 : i32
    return %c0_i32, %c0_i32_0 : i32, i32
  }
  func.func @transform_3(%arg0: i32) -> (i32, i32) {
    %c0_i32 = arith.constant 0 : i32
    %c0_i32_0 = arith.constant 0 : i32
    %c0_i32_1 = arith.constant 0 : i32
    return %c0_i32, %c0_i32_0 : i32, i32
  }
  func.func @transform_4(%arg0: i32) -> (i32, i32) {
    %c0_i32 = arith.constant 0 : i32
    %c0_i32_0 = arith.constant 0 : i32
    %c0_i32_1 = arith.constant 0 : i32
    return %c0_i32, %c0_i32_0 : i32, i32
  }
  func.func @transform_5(%arg0: i32) -> (i32, i32) {
    %c0_i32 = arith.constant 0 : i32
    %c0_i32_0 = arith.constant 0 : i32
    %c0_i32_1 = arith.constant 0 : i32
    return %c0_i32, %c0_i32_0 : i32, i32
  }
  func.func @transform_6(%arg0: i32) -> (i32, i32) {
    %c0_i32 = arith.constant 0 : i32
    %c0_i32_0 = arith.constant 0 : i32
    %c0_i32_1 = arith.constant 0 : i32
    return %c0_i32, %c0_i32_0 : i32, i32
  }
  func.func @transform_7(%arg0: i32) -> (i32, i32) {
    %c0_i32 = arith.constant 0 : i32
    %c0_i32_0 = arith.constant 0 : i32
    %c0_i32_1 = arith.constant 0 : i32
    return %c0_i32, %c0_i32_0 : i32, i32
  }
  func.func @transform_8(%arg0: i32) -> (i32, i32) {
    %c0_i32 = arith.constant 0 : i32
    %c0_i32_0 = arith.constant 0 : i32
    %c0_i32_1 = arith.constant 0 : i32
    return %c0_i32, %c0_i32_0 : i32, i32
  }
  func.func @transform_9(%arg0: i32) -> (i32, i32) {
    %c0_i32 = arith.constant 0 : i32
    %c0_i32_0 = arith.constant 0 : i32
    %c0_i32_1 = arith.constant 0 : i32
    return %c0_i32, %c0_i32_0 : i32, i32
  }
  func.func @transform_10(%arg0: i32) -> (i32, i32) {
    %c0_i32 = arith.constant 0 : i32
    %c0_i32_0 = arith.constant 0 : i32
    %c0_i32_1 = arith.constant 0 : i32
    return %c0_i32, %c0_i32_0 : i32, i32
  }
  func.func @transform_11(%arg0: i32) -> (i32, i32) {
    %c0_i32 = arith.constant 0 : i32
    %c0_i32_0 = arith.constant 0 : i32
    return %arg0, %c0_i32 : i32, i32
  }
}

</mosaic_0001>

<bundles_post_ra>
// kernel: tpu_custom_call.1
= control target key start
LH: loop header
LB: loop body
LE: loop exit
PB: predicated region body
PF: predicated region fallthrough
CT: control target
= control target key end

     0   :  { %16 = vsyncpa [#allocation3], 0  ;;  %s1307_s0 = inlined_call_operand.vmem [shape: f32[8,2], index: 0, kind: input, shape index: {}]   ;;  %s1308_s1 = inlined_call_operand.vmem [shape: f32[8,8], index: 1, kind: input, shape index: {}]   ;;  %s1309_s2 = inlined_call_operand.vmem [shape: f32[8,128], index: 2, kind: input, shape index: {}]   ;;  %s1310_s3 = inlined_call_operand.vmem [shape: f32[1,128], index: 3, kind: input, shape index: {}]   ;;  %s1311_s4 = inlined_call_operand.vmem [shape: f32[2,128], index: 4, kind: input, shape index: {}]   ;;  %s1312_s5 = inlined_call_operand.hbm [shape: f32[128,128], index: 5, kind: input, shape index: {}]   ;;  %s1313_s6 = inlined_call_operand.vmem [shape: f32[1,128], index: 6, kind: input, shape index: {}]   ;;  %s1314_s7 = inlined_call_operand.hbm [shape: f32[128,256], index: 7, kind: input, shape index: {}]   ;;  %s1315_s8 = inlined_call_operand.vmem [shape: f32[1,256], index: 8, kind: input, shape index: {}]   ;;  %s1316_s9 = inlined_call_operand.hbm [shape: f32[256,128], index: 9, kind: input, shape index: {}]   ;;  %s1317_s10 = inlined_call_operand.vmem [shape: f32[1,128], index: 10, kind: input, shape index: {}]   ;;  %s1318_s11 = inlined_call_operand.hbm [shape: f32[8,128], index: 11, kind: output, shape index: {}]  }
   0x1   :  { %17 = vsyncpa [#allocation6], 0 }
   0x2   :  { %18 = vsyncpa [#allocation4], 0  ;;  %s1071_s17 = smov [#allocation5]   ;;  %s977_s21 = scalar_lea.hbm %s1314_s7, 4096 }
   0x3   :  { %s48_s18 = sshll.u32 %s1071_s17, 4  ;;  %p978_p0 = scmp.ne.s32.totalorder %s1314_s7, %s977_s21  ;;  %s49_s18 = int_to_ptr.vmem [resolvable:$true] %s48_s18 }
   0x4   :  { %p981_p1 = scmp.lt.u32.totalorder %s977_s21, %s1314_s7 }
   0x6   :  { %p983_p2 = pnand %p981_p1, %p978_p0 }
   0x8   :  { %986 = shalt.err (!%p983_p2)
}
   0x9   :  { %s987_s26 = scalar_lea.vmem %s49_s18, 4096  ;;  %p992_p4 = scmp.lt.s32.totalorder %s49_s18, %s49_s18 }
   0xa   :  { %p988_p3 = scmp.ne.s32.totalorder %s49_s18, %s987_s26  ;;  %p993_p5 = scmp.lt.s32.totalorder %s987_s26, %s987_s26 }
   0xc   :  { %p994_p6 = por %p993_p5, %p992_p4 }
   0xe   :  { %p995_p7 = pnand %p994_p6, %p988_p3 }
  0x10   :  { %998 = shalt.err (!%p995_p7)
}
  0x11   :  { %s1072_s27 = smov 256   ;;  %s1073_s28 = smov 16  }
  0x12   :  { %54 = dma.hbm_to_vmem [thread:$0]  %s1314_s7, 4096, %s49_s18, [#allocation6], %s1072_s27, %s1072_s27, %s1073_s28  }
  0x13   :  { %s1074_s12 = smov [#allocation2]   ;;  %s999_s16 = scalar_lea.hbm %s1312_s5, 2048 }
  0x14   :  { %s34_s13 = sshll.u32 %s1074_s12, 4  ;;  %p1000_p8 = scmp.ne.s32.totalorder %s1312_s5, %s999_s16  ;;  %s35_s13 = int_to_ptr.vmem [resolvable:$true] %s34_s13 }
  0x15   :  { %p1003_p9 = scmp.lt.u32.totalorder %s999_s16, %s1312_s5 }
  0x17   :  { %p1005_p10 = pnand %p1003_p9, %p1000_p8 }
  0x19   :  { %1008 = shalt.err (!%p1005_p10)
}
  0x1a   :  { %s1009_s22 = scalar_lea.vmem %s35_s13, 2048  ;;  %p1014_p12 = scmp.lt.s32.totalorder %s35_s13, %s35_s13 }
  0x1b   :  { %p1010_p11 = scmp.ne.s32.totalorder %s35_s13, %s1009_s22  ;;  %p1015_p13 = scmp.lt.s32.totalorder %s1009_s22, %s1009_s22 }
  0x1d   :  { %p1016_p0 = por %p1015_p13, %p1014_p12 }
  0x1f   :  { %p1017_p1 = pnand %p1016_p0, %p1010_p11 }
  0x21   :  { %1020 = shalt.err (!%p1017_p1)
}
  0x22   :  { %s1075_s7 = smov 128   ;;  %s1076_s18 = smov 8  }
  0x23   :  { %40 = dma.hbm_to_vmem [thread:$0]  %s1312_s5, 2048, %s35_s13, [#allocation3], %s1075_s7, %s1075_s7, %s1076_s18  }
  0x24   :  { %s1077_s25 = smov [#allocation7]   ;;  %s1021_s29 = scalar_lea.hbm %s1316_s9, 4096 }
  0x25   :  { %s62_s26 = sshll.u32 %s1077_s25, 4  ;;  %p1022_p2 = scmp.ne.s32.totalorder %s1316_s9, %s1021_s29  ;;  %s63_s26 = int_to_ptr.vmem [resolvable:$true] %s62_s26 }
  0x26   :  { %p1025_p3 = scmp.lt.u32.totalorder %s1021_s29, %s1316_s9 }
  0x28   :  { %p1027_p4 = pnand %p1025_p3, %p1022_p2 }
  0x2a   :  { %1030 = shalt.err (!%p1027_p4)
}
  0x2b   :  { %s1031_s16 = scalar_lea.vmem %s63_s26, 4096  ;;  %p1036_p6 = scmp.lt.s32.totalorder %s63_s26, %s63_s26 }
  0x2c   :  { %p1032_p5 = scmp.ne.s32.totalorder %s63_s26, %s1031_s16  ;;  %p1037_p7 = scmp.lt.s32.totalorder %s1031_s16, %s1031_s16 }
  0x2e   :  { %p1038_p8 = por %p1037_p7, %p1036_p6 }
  0x30   :  { %p1039_p9 = pnand %p1038_p8, %p1032_p5 }
  0x32   :  { %1042 = shalt.err (!%p1039_p9)
}
  0x33   :  { %68 = dma.hbm_to_vmem [thread:$0]  %s1316_s9, 4096, %s63_s26, [#allocation6], %s1075_s7, %s1075_s7, %s1076_s18  }
  0x34   :  { %1065 = dma.done.wait [#allocation3], 2048  }
  0x35   :  { %1066 = vsyncadd [#allocation3], 4294965248 }
  0x36   :  { %1067 = dma.done.wait [#allocation6], 8192  }
  0x37   :  { %1068 = vsyncadd [#allocation6], 4294959104  ;;  %v1078_v0 = vmov 0.0   ;;  %vm1079_vm0 = vmmov 0   ;;  %vm112_vm1 = vcmask 64512   ;;  %v104_v1 = vld [vmem:[%s1309_s2] sm:$0xff] }
  0x38   :  { %807 = vmatprep.subr.mxu0 %v1078_v0  ;;  %809 = vmatprep.mubr.msk.f32.mxu0 %vm1079_vm0, %v1078_v0  ;;  %v103_v2 = vld [vmem:[%s1308_s1] sm:$0xff]  ;;  %v195_v7 = vld [vmem:[#allocation2] sm:$0xff]  ;;  %v196_v8 = vld [vmem:[#allocation2 + $0x8] sm:$0xff]  ;;  %v1080_v10 = vmov 0.0|0.0   ;;  %v1081_v39 = vmov 0   ;;  %v1082_v44 = vmov 1  }
  0x39   :  { %844 = vmatprep.mubr.msk.f32.mxu1 %vm1079_vm0, %v1078_v0  ;;  %808 = vmatpush3.msra.mxu0 %v104_v1  ;;  %v741_v3 = vld [vmem:[%s1310_s3] ss:$0 sm:$0xff]  ;;  %v197_v9 = vld [vmem:[#allocation2 + $0x10] sm:$0xff]  ;;  %v848_v11 = vpack.c.bf16 %v196_v8, %v195_v7  ;;  %v199_v14 = vld [vmem:[#allocation2 + $0x20] sm:$0xff]  ;;  %s1089_s26 = smov [#allocation8]  }
  0x3a   :  { %810 = vmatmul.mubr.msk.f32.vlgmr.msra.gmra.mrb[0].mxu0 %vm112_vm1, %v103_v2  ;;  %847 = vmatprep.subr.bf16.mxu1 %v1080_v10  ;;  %v198_v12 = vld [vmem:[#allocation2 + $0x18] sm:$0xff]  ;;  %v200_v15 = vld [vmem:[#allocation2 + $0x28] sm:$0xff]  ;;  %v201_v17 = vld [vmem:[#allocation2 + $0x30] sm:$0xff]  ;;  %s729_s27 = sshll.u32 %s1089_s26, 4  ;;  %s730_s27 = int_to_ptr.vmem [resolvable:$true] %s729_s27 }
  0x3b   :  { %398 = vmatprep.mubr.f32.mxu0 %v1078_v0  ;;  %849 = vmatpush3.bf16.msra.mxu1 %v848_v11  ;;  %v851_v13 = vpack.c.bf16 %v198_v12, %v197_v9  ;;  %v854_v16 = vpack.c.bf16 %v200_v15, %v199_v14  ;;  %v202_v18 = vld [vmem:[#allocation2 + $0x38] sm:$0xff]  ;;  %v203_v20 = vld [vmem:[#allocation2 + $0x40] sm:$0xff]  ;;  %v204_v21 = vld [vmem:[#allocation2 + $0x48] sm:$0xff]  ;;  %s1043_s28 = scalar_lea.vmem %s730_s27, 128  ;;  %p1048_p11 = scmp.lt.s32.totalorder %s730_s27, %s730_s27 }
  0x3c   :  { %850 = vmatprep.subr.bf16.mxu1 %v1080_v10  ;;  %v857_v19 = vpack.c.bf16 %v202_v18, %v201_v17  ;;  %v860_v22 = vpack.c.bf16 %v204_v21, %v203_v20  ;;  %v205_v27 = vld [vmem:[#allocation2 + $0x50] sm:$0xff]  ;;  %v206_v28 = vld [vmem:[#allocation2 + $0x58] sm:$0xff]  ;;  %v207_v30 = vld [vmem:[#allocation2 + $0x60] sm:$0xff]  ;;  %962 = vset.pattern.permute.xlu1 %v1081_v39  ;;  %p1044_p10 = scmp.ne.s32.totalorder %s730_s27, %s1043_s28  ;;  %p1049_p12 = scmp.lt.s32.totalorder %s1043_s28, %s1043_s28 }
  0x3d   :  { %v863_v29 = vpack.c.bf16 %v206_v28, %v205_v27  ;;  %v208_v31 = vld [vmem:[#allocation2 + $0x68] sm:$0xff]  ;;  %v209_v33 = vld [vmem:[#allocation2 + $0x70] sm:$0xff]  ;;  %v210_v34 = vld [vmem:[#allocation2 + $0x78] sm:$0xff]  ;;  %964 = vset.pattern.permute.xlu0 %v1082_v44 }
  0x3e   :  { %v866_v32 = vpack.c.bf16 %v208_v31, %v207_v30  ;;  %v869_v35 = vpack.c.bf16 %v210_v34, %v209_v33  ;;  %v80_v36 = vld [vmem:[%s1307_s0] sm:$0xff]  ;;  %v291_v37 = vld [vmem:[#allocation5 + $0x8] sm:$0xff]  ;;  %v290_v41 = vld [vmem:[#allocation5] sm:$0xff]  ;;  %p1050_p13 = por %p1049_p12, %p1048_p11 }
  0x3f   :  { %852 = vmatpush3.bf16.msra.mxu1 %v851_v13  ;;  %v293_v38 = vld [vmem:[#allocation5 + $0x18] sm:$0xff]  ;;  %v292_v42 = vld [vmem:[#allocation5 + $0x10] sm:$0xff]  ;;  %v295_v43 = vld [vmem:[#allocation5 + $0x28] sm:$0xff]  ;;  %84 = vperm.xlu1 %962, %v80_v36  }
  0x40   :  { %853 = vmatprep.subr.bf16.mxu1 %v1080_v10  ;;  %v871_v40 = vpack.c.bf16 %v293_v38, %v291_v37  ;;  %v873_v45 = vpack.c.bf16 %v292_v42, %v290_v41  ;;  %v297_v46 = vld [vmem:[#allocation5 + $0x38] sm:$0xff]  ;;  %v294_v47 = vld [vmem:[#allocation5 + $0x20] sm:$0xff]  ;;  %v296_v48 = vld [vmem:[#allocation5 + $0x30] sm:$0xff]  ;;  %p1051_p0 = pnand %p1050_p13, %p1044_p10 }
  0x41   :  { %v875_v49 = vpack.c.bf16 %v297_v46, %v295_v43  ;;  %v299_v50 = vld [vmem:[#allocation5 + $0x48] sm:$0xff]  ;;  %v301_v51 = vld [vmem:[#allocation5 + $0x58] sm:$0xff]  ;;  %v877_v52 = vpack.c.bf16 %v296_v48, %v294_v47  ;;  %v298_v54 = vld [vmem:[#allocation5 + $0x40] sm:$0xff] }
  0x42   :  { %872 = vmatprep.subr.bf16.mxu0 %v871_v40  ;;  %v879_v53 = vpack.c.bf16 %v301_v51, %v299_v50  ;;  %v300_v55 = vld [vmem:[#allocation5 + $0x50] sm:$0xff]  ;;  %v303_v56 = vld [vmem:[#allocation5 + $0x68] sm:$0xff]  ;;  %v305_v57 = vld [vmem:[#allocation5 + $0x78] sm:$0xff] }
  0x43   :  { %855 = vmatpush3.bf16.msra.mxu1 %v854_v16  ;;  %874 = vmatpush1.bf16.msra.mxu0 %v873_v45  ;;  %v881_v58 = vpack.c.bf16 %v300_v55, %v298_v54  ;;  %v883_v59 = vpack.c.bf16 %v305_v57, %v303_v56  ;;  %v302_v60 = vld [vmem:[#allocation5 + $0x60] sm:$0xff]  ;;  %v304_v61 = vld [vmem:[#allocation5 + $0x70] sm:$0xff]  ;;  %v307_v62 = vld [vmem:[#allocation5 + $0x88] sm:$0xff] }
  0x44   :  { %856 = vmatprep.subr.bf16.mxu1 %v1080_v10  ;;  %876 = vmatprep.subr.bf16.mxu0 %v875_v49  ;;  %v309_v63 = vld [vmem:[#allocation5 + $0x98] sm:$0xff]  ;;  %v885_v0 = vpack.c.bf16 %v304_v61, %v302_v60  ;;  %v306_v2 = vld [vmem:[#allocation5 + $0x80] sm:$0xff]  ;;  %v312_v9 = vld [vmem:[#allocation5 + $0xb0] sm:$0xff] }
  0x45   :  { %963 = vset.pattern.permute.xlu1 %v1082_v44  ;;  %v887_v1 = vpack.c.bf16 %v309_v63, %v307_v62  ;;  %v310_v8 = vld [vmem:[#allocation5 + $0xa0] sm:$0xff]  ;;  %v317_v11 = vld [vmem:[#allocation5 + $0xd8] sm:$0xff]  ;;  %v316_v15 = vld [vmem:[#allocation5 + $0xd0] sm:$0xff] }
  0x46   :  { %94 = vperm.xlu1 %963, %v80_v36   ;;  %v893_v12 = vpack.c.bf16 %v312_v9, %v310_v8  ;;  %v314_v14 = vld [vmem:[#allocation5 + $0xc0] sm:$0xff]  ;;  %v319_v20 = vld [vmem:[#allocation5 + $0xe8] sm:$0xff]  ;;  %v321_v21 = vld [vmem:[#allocation5 + $0xf8] sm:$0xff] }
  0x47   :  { %858 = vmatpush3.bf16.msra.mxu1 %v857_v19  ;;  %878 = vmatpush1.bf16.msra.mxu0 %v877_v52  ;;  %v897_v16 = vpack.c.bf16 %v316_v15, %v314_v14  ;;  %v739_v28 = vld [vmem:[%s1311_s4] ss:$0 sm:$0xff]  ;;  %v629_v38 = vld [vmem:[#allocation7 + $0x80] sm:$0xff]  ;;  %v630_v39 = vld [vmem:[#allocation7 + $0x88] sm:$0xff] }
  0x48   :  { %859 = vmatprep.subr.bf16.mxu1 %v1080_v10  ;;  %880 = vmatprep.subr.bf16.mxu0 %v879_v53  ;;  %v743_v34 = vld [vmem:[%s1313_s6] ss:$0 sm:$0xff]  ;;  %v903_v40 = vpack.c.bf16 %v630_v39, %v629_v38  ;;  %v613_v41 = vld [vmem:[#allocation7] sm:$0xff]  ;;  %v614_v42 = vld [vmem:[#allocation7 + $0x8] sm:$0xff] }
  0x49   :  { %v905_v43 = vpack.c.bf16 %v614_v42, %v613_v41  ;;  %v631_v44 = vld [vmem:[#allocation7 + $0x90] sm:$0xff]  ;;  %v632_v45 = vld [vmem:[#allocation7 + $0x98] sm:$0xff]  ;;  %v633_v50 = vld [vmem:[#allocation7 + $0xa0] sm:$0xff] }
  0x4a   :  { %v907_v46 = vpack.c.bf16 %v632_v45, %v631_v44  ;;  %v615_v47 = vld [vmem:[#allocation7 + $0x10] sm:$0xff]  ;;  %v616_v48 = vld [vmem:[#allocation7 + $0x18] sm:$0xff]  ;;  %v634_v51 = vld [vmem:[#allocation7 + $0xa8] sm:$0xff] }
  0x4b   :  { %861 = vmatpush3.bf16.msra.mxu1 %v860_v22  ;;  %882 = vmatpush1.bf16.msra.mxu0 %v881_v58  ;;  %v899_v22 = vpack.c.bf16 %v321_v21, %v319_v20  ;;  %v909_v49 = vpack.c.bf16 %v616_v48, %v615_v47  ;;  %v911_v52 = vpack.c.bf16 %v634_v51, %v633_v50  ;;  %v617_v53 = vld [vmem:[#allocation7 + $0x20] sm:$0xff]  ;;  %v618_v54 = vld [vmem:[#allocation7 + $0x28] sm:$0xff]  ;;  %v635_v56 = vld [vmem:[#allocation7 + $0xb0] sm:$0xff] }
  0x4c   :  { %862 = vmatprep.subr.bf16.mxu1 %v1080_v10  ;;  %884 = vmatprep.subr.bf16.mxu0 %v883_v59  ;;  %v913_v55 = vpack.c.bf16 %v618_v54, %v617_v53  ;;  %v636_v57 = vld [vmem:[#allocation7 + $0xb8] sm:$0xff]  ;;  %v619_v58 = vld [vmem:[#allocation7 + $0x30] sm:$0xff]  ;;  %v637_v61 = vld [vmem:[#allocation7 + $0xc0] sm:$0xff]  ;;  %v1083_v53 = vmov 683565275  }
  0x4d   :  { %v915_v59 = vpack.c.bf16 %v636_v57, %v635_v56  ;;  %v620_v60 = vld [vmem:[#allocation7 + $0x38] sm:$0xff]  ;;  %v638_v62 = vld [vmem:[#allocation7 + $0xc8] sm:$0xff]  ;;  %v641_v9 = vld [vmem:[#allocation7 + $0xe0] sm:$0xff]  ;;  %v1084_v57 = vmov 2475754826  }
  0x4e   :  { %v917_v63 = vpack.c.bf16 %v620_v60, %v619_v58  ;;  %v624_v8 = vld [vmem:[#allocation7 + $0x58] sm:$0xff]  ;;  %v626_v14 = vld [vmem:[#allocation7 + $0x68] sm:$0xff]  ;;  %v643_v15 = vld [vmem:[#allocation7 + $0xf0] sm:$0xff] }
  0x4f   :  { %864 = vmatpush3.bf16.msra.mxu1 %v863_v29  ;;  %886 = vmatpush1.bf16.msra.mxu0 %v885_v0  ;;  %v740_v29 = vld [vmem:[%s1311_s4 + $0x1] ss:$0 sm:$0xff]  ;;  %v919_v0 = vpack.c.bf16 %v638_v62, %v637_v61  ;;  %v1086_v61 = vmov 2102212464  }
  0x50   :  { %865 = vmatprep.subr.bf16.mxu1 %v1080_v10  ;;  %888 = vmatprep.subr.bf16.mxu0 %v887_v1  ;;  %v621_v1 = vld [vmem:[#allocation7 + $0x40] sm:$0xff]  ;;  %v628_v20 = vld [vmem:[#allocation7 + $0x78] sm:$0xff] }
  0x53   :  { %867 = vmatpush3.bf16.msra.mxu1 %v866_v32 }
  0x54   :  { %868 = vmatprep.subr.bf16.mxu1 %v1080_v10  ;;  %v315_v10 = vld [vmem:[#allocation5 + $0xc8] sm:$0xff] }
  0x55   :  { %v895_v13 = vpack.c.bf16 %v317_v11, %v315_v10  ;;  %v642_v10 = vld [vmem:[#allocation7 + $0xe8] sm:$0xff] }
  0x57   :  { %870 = vmatpush3.bf16.msra.mxu1 %v869_v35 }
  0x58   :  { %904 = vmatprep.subr.bf16.mxu1 %v903_v40 }
  0xbe   :  { %v85_v27 = vpop.permute.xlu1 %84 }
  0xc5   :  { %v95_v30 = vpop.permute.xlu1 %94 }
  0xc6   :  { %v101_v31 = vmul.f32 %v740_v29, %v95_v30 }
 0x10d   :  { %v182_v4 = vpop.f32.mrb[0].mxu0 }
 0x10e   :  { %v183_v5 = vadd.f32 %v741_v3, %v182_v4  ;;  %v811_v6 = vpop.f32.mrb[1].mxu0  ;;  %v308_v3 = vld [vmem:[#allocation5 + $0x90] sm:$0xff]  ;;  %v311_v4 = vld [vmem:[#allocation5 + $0xa8] sm:$0xff] }
 0x10f   :  { %v889_v6 = vpack.c.bf16 %v308_v3, %v306_v2  ;;  %v622_v2 = vld [vmem:[#allocation7 + $0x48] sm:$0xff]  ;;  %v639_v3 = vld [vmem:[#allocation7 + $0xd0] sm:$0xff] }
 0x110   :  { %186 = vmax.xlane.f32.xlu0 %v183_v5 }
 0x111   :  { %890 = vmatpush1.bf16.msra.mxu0 %v889_v6 }
 0x19d   :  { %v187_v23 = vpop.xlane.xlu0 %186 }
 0x19e   :  { %v188_v24 = vsub.f32 %v183_v5, %v187_v23  ;;  %v313_v5 = vld [vmem:[#allocation5 + $0xb8] sm:$0xff]  ;;  %v318_v23 = vld [vmem:[#allocation5 + $0xe0] sm:$0xff] }
 0x19f   :  { %v891_v7 = vpack.c.bf16 %v313_v5, %v311_v4  ;;  %v640_v4 = vld [vmem:[#allocation7 + $0xd8] sm:$0xff]  ;;  %v921_v5 = vpack.c.bf16 %v622_v2, %v621_v1 }
 0x1a0   :  { %v189_v25 = vmul.f32 1.442695, %v188_v24  ;;  %v320_v24 = vld [vmem:[#allocation5 + $0xf0] sm:$0xff]  ;;  %v923_v6 = vpack.c.bf16 %v640_v4, %v639_v3 }
 0x1a1   :  { %892 = vmatprep.subr.bf16.mxu0 %v891_v7  ;;  %v623_v7 = vld [vmem:[#allocation7 + $0x50] sm:$0xff] }
 0x1a2   :  { %965 = vpow2.f32 %v189_v25  ;;  %894 = vmatpush1.bf16.msra.mxu0 %v893_v12  ;;  %v901_v25 = vpack.c.bf16 %v320_v24, %v318_v23  ;;  %v925_v11 = vpack.c.bf16 %v624_v8, %v623_v7  ;;  %v927_v12 = vpack.c.bf16 %v642_v10, %v641_v9 }
 0x1a3   :  { %896 = vmatprep.subr.bf16.mxu0 %v895_v13  ;;  %v625_v13 = vld [vmem:[#allocation7 + $0x60] sm:$0xff] }
 0x1a6   :  { %898 = vmatpush1.bf16.msra.mxu0 %v897_v16  ;;  %v644_v16 = vld [vmem:[#allocation7 + $0xf8] sm:$0xff] }
 0x1a7   :  { %900 = vmatprep.subr.bf16.mxu0 %v899_v22  ;;  %v324_v22 = vlaneseq }
 0x1a9   :  { %v325_v23 = vshrl.u32 %v324_v22, 7 }
 0x1aa   :  { %902 = vmatpush1.bf16.msra.mxu0 %v901_v25  ;;  %v322_v25 = vld [vmem:[%s1315_s8] sm:$0x3] }
 0x1ab   :  { %v326_v24 = vsub.s32 0, %v325_v23 }
 0x1ac   :  { %v1195_v26 = vpop.eup %965 }
 0x1ad   :  { %191 = vadd.xlane.f32.xlu0 %v1195_v26 }
 0x23a   :  { %v192_v17 = vpop.xlane.xlu0 %191 }
 0x23b   :  { %967 = vrcp.f32 %v192_v17  ;;  %v929_v17 = vpack.c.bf16 %v626_v14, %v625_v13 }
 0x245   :  { %v968_v18 = vpop.eup %967 }
 0x246   :  { %v194_v19 = vmul.f32 %v968_v18, %v1195_v26  ;;  %v91_v26 = vmul.f32 %v739_v28, %v85_v27  ;;  %v931_v18 = vpack.c.bf16 %v644_v16, %v643_v15  ;;  %v330_v27 = vsub.s32 1, %v325_v23 }
 0x247   :  { %v327_v28 = vrot.slane %v322_v25, %v326_v24 }
 0x248   :  { %845 = vmatmul.mubr.f32.vlgmr.msra.gmra.mrb[0].mxu1 %v194_v19  ;;  %v102_v32 = vadd.f32 %v101_v31, %v91_v26  ;;  %v627_v19 = vld [vmem:[#allocation7 + $0x70] sm:$0xff]  ;;  %v331_v29 = vrot.slane %v322_v25, %v330_v27 }
 0x249   :  { %906 = vmatpush3.bf16.msra.mxu1 %v905_v43  ;;  %v933_v21 = vpack.c.bf16 %v628_v20, %v627_v19 }
 0x24a   :  { %908 = vmatprep.subr.bf16.mxu1 %v907_v46 }
 0x24d   :  { %910 = vmatpush3.bf16.msra.mxu1 %v909_v49 }
 0x24e   :  { %912 = vmatprep.subr.bf16.mxu1 %v911_v52 }
 0x251   :  { %914 = vmatpush3.bf16.msra.mxu1 %v913_v55 }
 0x252   :  { %916 = vmatprep.subr.bf16.mxu1 %v915_v59  ;;  %v1085_v59 = vmov 2131351028  }
 0x255   :  { %918 = vmatpush3.bf16.msra.mxu1 %v917_v63  ;;  %v1087_v63 = vmov 920167782  }
 0x256   :  { %920 = vmatprep.subr.bf16.mxu1 %v919_v0 }
 0x259   :  { %922 = vmatpush3.bf16.msra.mxu1 %v921_v5 }
 0x25a   :  { %924 = vmatprep.subr.bf16.mxu1 %v923_v6  ;;  %v1088_v6 = vmov 1326507024  }
 0x25d   :  { %926 = vmatpush3.bf16.msra.mxu1 %v925_v11 }
 0x25e   :  { %928 = vmatprep.subr.bf16.mxu1 %v927_v12 }
 0x261   :  { %930 = vmatpush3.bf16.msra.mxu1 %v929_v17 }
 0x262   :  { %932 = vmatprep.subr.bf16.mxu1 %v931_v18 }
 0x265   :  { %934 = vmatpush3.bf16.msra.mxu1 %v933_v21 }
 0x31b   :  { %v277_v33 = vpop.f32.mrb[0].mxu1 }
 0x31c   :  { %v281_v35 = vadd.f32 %v277_v33, %v102_v32  ;;  %v846_v36 = vpop.f32.mrb[1].mxu1 }
 0x31e   :  { %v289_v37 = vadd.f32 %v743_v34, %v281_v35 }
 0x320   :  { %399 = vmatmul.mubr.f32.vlgmr.msra.gmra.mrb[2].mxu0 %v289_v37 }
 0x3f3   :  { %v400_v30 = vpop.f32.mrb[2].mxu0 }
 0x3f4   :  { %v1214_v26 = vadd.f32 %v400_v30, %v327_v28  ;;  %v402_v31 = vpop.f32.mrb[3].mxu0 }
 0x3f5   :  { %v1216_v32 = vadd.f32 %v402_v31, %v331_v29 }
 0x3f6   :  { %v405_v33 = vand.u32 2147483647, %v1214_v26  ;;  %v408_v34 = vand.u32 2139095040, %v1214_v26  ;;  %vm407_vm0 = vcmp.lt.s32.totalorder %v1214_v26, 0 }
 0x3f7   :  { %v511_v35 = vand.u32 2139095040, %v1216_v32  ;;  %v508_v38 = vand.u32 2147483647, %v1216_v32 }
 0x3f8   :  { %v409_v36 = vshrl.u32 %v408_v34, 23  ;;  %v412_v37 = vand.u32 8388607, %v405_v33  ;;  %vm1269_vm1 = vcmp.le.f32.partialorder %v405_v33, 0.7853982 }
 0x3f9   :  { %v512_v39 = vshrl.u32 %v511_v35, 23  ;;  %v1226_v44 = vand.u32 8388607, %v508_v38 }
 0x3fa   :  { %v744_v40 = vadd.s32 4294967169, %v409_v36  ;;  %v413_v43 = vor.u32 8388608, %v412_v37 }
 0x3fb   :  { %v748_v41 = vadd.s32 4294967169, %v512_v39  ;;  %v516_v51 = vor.u32 8388608, %v1226_v44 }
 0x3fc   :  { %v415_v42 = vadd.s32 1, %v744_v40  ;;  %v1228_v50 = vshll.u32 %v413_v43, 8 }
 0x3fd   :  { %v518_v45 = vadd.s32 1, %v748_v41 }
 0x3fe   :  { %vm416_vm2 = vcmp.gt.s32.totalorder %v415_v42, 0 }
 0x3ff   :  { %v417_v46 = vsel %vm416_vm2, %v415_v42, 0  ;;  %vm519_vm3 = vcmp.gt.s32.totalorder %v518_v45, 0  ;;  %vm510_vm2 = vcmp.lt.s32.totalorder %v1216_v32, 0 }
 0x400   :  { %v418_v47 = vshrl.u32 %v417_v46, 5  ;;  %v419_v48 = vand.u32 31, %v417_v46  ;;  %v520_v49 = vsel %vm519_vm3, %v518_v45, 0  ;;  %v556_v45 = vshll.u32 %v516_v51, 8 }
 0x401   :  { %v1231_v55 = vshrl.u32 %v520_v49, 5  ;;  %v522_v56 = vand.u32 31, %v520_v49  ;;  %vm1281_vm3 = vcmp.le.f32.partialorder %v508_v38, 0.7853982 }
 0x402   :  { %v420_v52 = vsub.s32 32, %v419_v48  ;;  %v422_v54 = vshll.u32 %v1083_v53, %v419_v48  ;;  %v425_v58 = vshll.u32 %v1084_v57, %v419_v48  ;;  %v428_v60 = vshll.u32 %v1085_v59, %v419_v48 }
 0x403   :  { %v431_v62 = vshll.u32 %v1086_v61, %v419_v48  ;;  %v434_v0 = vshll.u32 %v1087_v63, %v419_v48  ;;  %vm437_vm4 = vcmp.lt.s32.totalorder %v418_v47, 1  ;;  %vm438_vm5 = vcmp.lt.s32.totalorder %v418_v47, 2 }
 0x404   :  { %v423_v1 = vshrl.u32 %v1084_v57, %v420_v52  ;;  %v426_v2 = vshrl.u32 %v1085_v59, %v420_v52  ;;  %v429_v3 = vshrl.u32 %v1086_v61, %v420_v52  ;;  %v421_v4 = vshrl.u32 %v1083_v53, %v420_v52 }
 0x405   :  { %v432_v5 = vshrl.u32 %v1087_v63, %v420_v52  ;;  %v435_v7 = vshrl.u32 %v1088_v6, %v420_v52  ;;  %v523_v11 = vsub.s32 32, %v522_v56  ;;  %vm439_vm6 = vcmp.lt.s32.totalorder %v418_v47, 3 }
 0x406   :  { %v424_v8 = vor.u32 %v423_v1, %v422_v54  ;;  %v427_v9 = vor.u32 %v426_v2, %v425_v58  ;;  %v430_v10 = vor.u32 %v429_v3, %v428_v60  ;;  %vm440_vm7 = vcmp.lt.s32.totalorder %v418_v47, 4 }
 0x407   :  { %v433_v12 = vor.u32 %v432_v5, %v431_v62  ;;  %v436_v13 = vor.u32 %v435_v7, %v434_v0  ;;  %v525_v21 = vshll.u32 %v1083_v53, %v522_v56  ;;  %v526_v24 = vshrl.u32 %v1084_v57, %v523_v11 }
 0x408   :  { %v441_v14 = vsel %vm437_vm4, %v421_v4, %v424_v8  ;;  %v442_v15 = vsel %vm440_vm7, %v430_v10, 2102212464  ;;  %v445_v16 = vsel %vm437_vm4, %v424_v8, %v427_v9  ;;  %v449_v17 = vsel %vm437_vm4, %v427_v9, %v430_v10 }
 0x409   :  { %v443_v18 = vsel %vm439_vm6, %v427_v9, %v442_v15  ;;  %v446_v19 = vsel %vm440_vm7, %v433_v12, 920167782  ;;  %v450_v20 = vsel %vm440_vm7, %v436_v13, 1326507024  ;;  %v528_v25 = vshll.u32 %v1084_v57, %v522_v56 }
 0x40a   :  { %v447_v22 = vsel %vm439_vm6, %v430_v10, %v446_v19  ;;  %v451_v23 = vsel %vm439_vm6, %v433_v12, %v450_v20  ;;  %v444_v27 = vsel %vm438_vm5, %v441_v14, %v443_v18  ;;  %v529_v30 = vshrl.u32 %v1085_v59, %v523_v11 }
 0x40b   :  { %v448_v28 = vsel %vm438_vm5, %v445_v16, %v447_v22  ;;  %v452_v29 = vsel %vm438_vm5, %v449_v17, %v451_v23  ;;  %v527_v37 = vor.u32 %v526_v24, %v525_v21  ;;  %v531_v40 = vshll.u32 %v1085_v59, %v522_v56 }
 0x40c   :  { %v1240_v31 = vmul.u32.u64.low %v1228_v50, %v452_v29  ;;  %v1241_v34 = vmul.u32.u64.high %v1228_v50, %v452_v29, %v1240_v31  ;;  %v1244_v35 = vmul.u32.u64.low %v1228_v50, %v448_v28  ;;  %v1245_v36 = vmul.u32.u64.high %v1228_v50, %v448_v28, %v1244_v35 }
 0x40d   :  { %v530_v39 = vor.u32 %v529_v30, %v528_v25  ;;  %v532_v41 = vshrl.u32 %v1086_v61, %v523_v11  ;;  %v534_v42 = vshll.u32 %v1086_v61, %v522_v56  ;;  %v535_v43 = vshrl.u32 %v1087_v63, %v523_v11 }
 0x40e   :  { %v538_v44 = vshrl.u32 %v1088_v6, %v523_v11  ;;  %v460_v46 = vmul.u32 %v1228_v50, %v444_v27  ;;  %v524_v47 = vshrl.u32 %v1083_v53, %v523_v11  ;;  %v537_v49 = vshll.u32 %v1087_v63, %v522_v56 }
 0x40f   :  { %v533_v48 = vor.u32 %v532_v41, %v531_v40  ;;  %vm462_vm8 = vc.u32 %v1241_v34, %v1244_v35  ;;  %v463_v52 = vadd.s32 1, %v1245_v36  ;;  %v536_v54 = vor.u32 %v535_v43, %v534_v42 }
 0x410   :  { %vm540_vm9 = vcmp.lt.s32.totalorder %v1231_v55, 1  ;;  %v539_v57 = vor.u32 %v538_v44, %v537_v49  ;;  %vm542_vm10 = vcmp.lt.s32.totalorder %v1231_v55, 3  ;;  %vm543_vm11 = vcmp.lt.s32.totalorder %v1231_v55, 4 }
 0x411   :  { %v548_v58 = vsel %vm540_vm9, %v527_v37, %v530_v39  ;;  %v464_v51 = vsel %vm462_vm8, %v463_v52, %v1245_v36  ;;  %v545_v59 = vsel %vm543_vm11, %v533_v48, 2102212464  ;;  %v549_v50 = vsel %vm543_vm11, %v536_v54, 920167782 }
 0x412   :  { %v552_v53 = vsel %vm540_vm9, %v530_v39, %v533_v48  ;;  %v465_v60 = vadd.s32 %v464_v51, %v460_v46  ;;  %vm541_vm12 = vcmp.lt.s32.totalorder %v1231_v55, 2  ;;  %v550_v56 = vsel %vm542_vm10, %v533_v48, %v549_v50 }
 0x413   :  { %v553_v61 = vsel %vm543_vm11, %v539_v57, 1326507024  ;;  %v544_v62 = vsel %vm540_vm9, %v524_v47, %v527_v37  ;;  %v546_v63 = vsel %vm542_vm10, %v530_v39, %v545_v59  ;;  %v551_v0 = vsel %vm541_vm12, %v548_v58, %v550_v56 }
 0x414   :  { %v554_v1 = vsel %vm542_vm10, %v536_v54, %v553_v61  ;;  %v466_v2 = vadd.s32 536870912, %v465_v60  ;;  %v1255_v4 = vmul.u32.u64.low %v556_v45, %v551_v0  ;;  %v1256_v5 = vmul.u32.u64.high %v556_v45, %v551_v0, %v1255_v4 }
 0x415   :  { %v555_v3 = vsel %vm541_vm12, %v552_v53, %v554_v1  ;;  %v547_v9 = vsel %vm541_vm12, %v544_v62, %v546_v63  ;;  %v461_v25 = vadd.s32 %v1244_v35, %v1241_v34  ;;  %vm497_vm7 = vweird.f32 %v1214_v26 }
 0x416   :  { %v1258_v6 = vmul.u32.u64.low %v556_v45, %v555_v3  ;;  %v1259_v7 = vmul.u32.u64.high %v556_v45, %v555_v3, %v1258_v6  ;;  %v467_v8 = vshrl.u32 %v466_v2, 30  ;;  %v566_v11 = vadd.s32 1, %v1256_v5 }
 0x417   :  { %v563_v55 = vmul.u32 %v556_v45, %v547_v9  ;;  %vm600_vm11 = vweird.f32 %v1216_v32 }
 0x418   :  { %v468_v10 = vshll.u32 %v467_v8, 30  ;;  %vm565_vm13 = vc.u32 %v1259_v7, %v1255_v4  ;;  %v564_v46 = vadd.s32 %v1255_v4, %v1259_v7  ;;  %v491_v50 = vsub.s32 4, %v467_v8 }
 0x419   :  { %v567_v13 = vsel %vm565_vm13, %v566_v11, %v1256_v5 }
 0x41a   :  { %v469_v12 = vsub.s32 %v465_v60, %v468_v10  ;;  %v568_v14 = vadd.s32 %v567_v13, %v563_v55  ;;  %v492_v62 = vsel %vm407_vm0, %v491_v50, %v467_v8 }
 0x41b   :  { %v494_v33 = vsel %vm1269_vm1, 0, %v492_v62 }
 0x41c   :  { %v471_v15 = vsub.s32 0, %v469_v12  ;;  %v569_v16 = vadd.s32 536870912, %v568_v14  ;;  %v498_v5 = vand.u32 3, %v494_v33 }
 0x41e   :  { %v745_v17 = vmin.u32 %v471_v15, %v469_v12  ;;  %v570_v18 = vshrl.u32 %v569_v16, 30  ;;  %vm503_vm4 = vcmp.eq.s32.totalorder %v498_v5, 2  ;;  %vm500_vm5 = vcmp.eq.s32.totalorder %v498_v5, 0 }
 0x41f   :  { %vm499_vm6 = vcmp.lt.s32.totalorder %v498_v5, 2 }
 0x420   :  { %v473_v19 = vclz %v745_v17  ;;  %v571_v20 = vshll.u32 %v570_v18, 30  ;;  %v594_v3 = vsub.s32 4, %v570_v18 }
 0x422   :  { %v746_v21 = vadd.s32 4294967294, %v473_v19  ;;  %v572_v22 = vsub.s32 %v568_v14, %v571_v20  ;;  %v595_v8 = vsel %vm510_vm2, %v594_v3, %v570_v18 }
 0x423   :  { %v597_v11 = vsel %vm1281_vm3, 0, %v595_v8 }
 0x424   :  { %vm747_vm14 = vcmp.lt.s32.totalorder %v746_v21, 0  ;;  %v574_v24 = vsub.s32 0, %v572_v22  ;;  %v601_v14 = vand.u32 3, %v597_v11 }
 0x425   :  { %v476_v23 = vsel %vm747_vm14, 0, %v746_v21 }
 0x426   :  { %v477_v27 = vsub.s32 32, %v476_v23  ;;  %v481_v28 = vsub.s32 4294967266, %v476_v23  ;;  %v749_v29 = vmin.u32 %v574_v24, %v572_v22  ;;  %v478_v30 = vshll.u32 %v469_v12, %v476_v23 }
 0x427   :  { %vm606_vm8 = vcmp.eq.s32.totalorder %v601_v14, 2  ;;  %vm603_vm9 = vcmp.eq.s32.totalorder %v601_v14, 0  ;;  %vm602_vm10 = vcmp.lt.s32.totalorder %v601_v14, 2 }
 0x428   :  { %v479_v31 = vshrl.u32 %v461_v25, %v477_v27  ;;  %v482_v36 = vadd.s32 127, %v481_v28  ;;  %v576_v37 = vclz %v749_v29  ;;  %v752_v25 = vld [vmem:[%s1317_s10] ss:$0 sm:$0xff] }
 0x42a   :  { %v480_v39 = vor.u32 %v479_v31, %v478_v30  ;;  %v483_v40 = vshll.u32 %v482_v36, 23  ;;  %v750_v41 = vadd.s32 4294967294, %v576_v37 }
 0x42c   :  { %v484_v42 = vor.u32 4788187, %v483_v40  ;;  %vm751_vm15 = vcmp.lt.s32.totalorder %v750_v41, 0  ;;  %v487_v44 = vcvt.s32.f32 %v480_v39 }
 0x42d   :  { %v579_v45 = vsel %vm751_vm15, 0, %v750_v41 }
 0x42e   :  { %v485_v43 = vand.u32 2147483647, %v484_v42  ;;  %v580_v47 = vsub.s32 32, %v579_v45  ;;  %v584_v48 = vsub.s32 4294967266, %v579_v45  ;;  %v581_v35 = vshll.u32 %v572_v22, %v579_v45 }
 0x430   :  { %v488_v34 = vmul.f32 %v487_v44, %v485_v43  ;;  %v582_v49 = vshrl.u32 %v564_v46, %v580_v47  ;;  %v585_v52 = vadd.s32 127, %v584_v48 }
 0x432   :  { %v489_v54 = vxor.u32 2147483648, %v488_v34  ;;  %v583_v57 = vor.u32 %v582_v49, %v581_v35  ;;  %v586_v58 = vshll.u32 %v585_v52, 23 }
 0x434   :  { %v490_v59 = vsel %vm407_vm0, %v489_v54, %v488_v34  ;;  %v587_v60 = vor.u32 4788187, %v586_v58  ;;  %v590_v61 = vcvt.s32.f32 %v583_v57 }
 0x435   :  { %v493_v53 = vsel %vm1269_vm1, %v1214_v26, %v490_v59 }
 0x436   :  { %969 = vcosq.f32 %v493_v53  ;;  %v588_v56 = vand.u32 2147483647, %v587_v60 }
 0x437   :  { %971 = vsinq.f32 %v493_v53 }
 0x438   :  { %v591_v63 = vmul.f32 %v590_v61, %v588_v56 }
 0x43a   :  { %v592_v0 = vxor.u32 2147483648, %v591_v63 }
 0x43c   :  { %v593_v2 = vsel %vm510_vm2, %v592_v0, %v591_v63 }
 0x43d   :  { %v596_v4 = vsel %vm1281_vm3, %v1216_v32, %v593_v2 }
 0x43e   :  { %973 = vcosq.f32 %v596_v4 }
 0x43f   :  { %975 = vsinq.f32 %v596_v4 }
 0x440   :  { %v970_v6 = vpop.eup %969 }
 0x441   :  { %v972_v7 = vpop.eup %971  ;;  %v504_v9 = vxor.u32 2147483648, %v970_v6 }
 0x442   :  { %v501_v10 = vxor.u32 2147483648, %v972_v7 }
 0x443   :  { %v505_v38 = vsel %vm503_vm4, %v504_v9, %v972_v7 }
 0x444   :  { %v502_v55 = vsel %vm500_vm5, %v970_v6, %v501_v10 }
 0x445   :  { %v506_v12 = vsel %vm499_vm6, %v502_v55, %v505_v38 }
 0x446   :  { %v507_v13 = vsel %vm497_vm7, nan, %v506_v12 }
 0x447   :  { %v611_v24 = vmul.f32 0.088388346, %v507_v13 }
 0x448   :  { %v974_v15 = vpop.eup %973 }
 0x449   :  { %v976_v16 = vpop.eup %975  ;;  %v607_v17 = vxor.u32 2147483648, %v974_v15 }
 0x44a   :  { %v604_v19 = vxor.u32 2147483648, %v976_v16 }
 0x44b   :  { %v608_v18 = vsel %vm606_vm8, %v607_v17, %v976_v16 }
 0x44c   :  { %v605_v20 = vsel %vm603_vm9, %v974_v15, %v604_v19 }
 0x44d   :  { %v609_v21 = vsel %vm602_vm10, %v605_v20, %v608_v18 }
 0x44e   :  { %v610_v22 = vsel %vm600_vm11, nan, %v609_v21 }
 0x44f   :  { %v612_v23 = vmul.f32 0.088388346, %v610_v22 }
 0x451   :  { %716 = vmatprep.mubr.f32.mxu1 %v612_v23 }
 0x452   :  { %717 = vmatmul.mubr.f32.vlgmr.msra.gmra.mrb[2].mxu1 %v611_v24 }
 0x525   :  { %v804_v26 = vpop.f32.mrb[2].mxu1 }
 0x526   :  { %v805_v27 = vpop.f32.mrb[3].mxu1 }
 0x527   :  { %v806_v28 = vadd.f32 %v805_v27, %v804_v26 }
 0x529   :  { %v719_v29 = vadd.f32 %v806_v28, %v752_v25 }
 0x52b   :  { %722 = vst [vmem:[#allocation8] sm:$0xff] %v719_v29 }
 0x52c   :  { %1054 = shalt.err (!%p1051_p0)
}
 0x52d   :  { %s1055_s12 = scalar_lea.hbm %s1318_s11, 128 }
 0x52e   :  { %p1056_p1 = scmp.ne.s32.totalorder %s1318_s11, %s1055_s12  ;;  %p1059_p2 = scmp.lt.u32.totalorder %s1055_s12, %s1318_s11 }
 0x530   :  { %p1061_p3 = pnand %p1059_p2, %p1056_p1 }
 0x532   :  { %1064 = shalt.err (!%p1061_p3)
}
 0x533   :  { %732 = dma.vmem_to_hbm [thread:$0]  %s730_s27, 128, %s1318_s11, [#allocation4]  }
 0x534   :  { %1069 = dma.done.wait [#allocation4], 128  }
 0x535   :  { %1070 = vsyncadd [#allocation4], 4294967168 }
 0x536   :  { %736 = vsyncpa [#allocation3], 1 }
 0x537   :  { %737 = vsyncpa [#allocation6], 1 }
 0x538   :  { %738 = vsyncpa [#allocation4], 1 }

</bundles_post_ra>
